<compile_context>
chip_gen: v7x
topology: tpu7x:2x2x1
jax: 0.10.0
libtpu: 0.0.40
codegen_flags: <defaults>
</compile_context>

<pallas_src>
import functools

import jax
import jax.numpy as jnp
import numpy as np
from jax.experimental import pallas as pl
from jax.experimental.pallas import tpu as pltpu


GROUPS = 4
EPS = 1e-5


def _leaky(x):
    return jnp.where(x > 0, x, 0.1 * x)


def _group_norm(x, gamma, beta, avg):
    # avg: [C, C] block-averaging matrix (1/group_size inside each group block).
    # Two small MXU dots replace the reshape/mean reductions; f32 throughout.
    mean = jnp.dot(x, avg, preferred_element_type=jnp.float32)
    meansq = jnp.dot(x * x, avg, preferred_element_type=jnp.float32)
    var = meansq - mean * mean
    return (x - mean) * jax.lax.rsqrt(var + EPS) * gamma + beta


def gang_kernel(L, H,
                xin_ref,
                w_mi_ref, gnmi_w_ref, gnmi_b_ref,
                w1x_ref, w1m_ref, b1_ref, gn1_w_ref, gn1_b_ref,
                w2_ref, gn2_w_ref, gn2_b_ref,
                w3_ref, b3_ref,
                gn_avg_ref,
                out_ref):
    f32, bf16 = jnp.float32, jnp.bfloat16
    avg = gn_avg_ref[...]
    xin = xin_ref[...]                                     # [TB, d_full] bf16

    # ---- memory_init branch: Linear(no bias) -> GN4 -> LeakyReLU.
    # w_mi rows for the non-minit slab columns are zero, so the full slab feeds it.
    m0 = jnp.dot(xin, w_mi_ref[...], preferred_element_type=f32)
    memory = _leaky(_group_norm(m0, gnmi_w_ref[...], gnmi_b_ref[...], avg))

    # ---- model[0]: Linear over [code|action|tau] (tau*2-1 folded, minit rows
    # zeroed) plus the in-kernel memory path; bf16 MXU feed, f32 accumulate.
    h = (jnp.dot(xin, w1x_ref[...], preferred_element_type=f32)
         + jnp.dot(memory.astype(bf16), w1m_ref[...], preferred_element_type=f32)
         + b1_ref[...])
    # model[1:3]: LeakyReLU -> GroupNorm
    h = _group_norm(_leaky(h), gn1_w_ref[...], gn1_b_ref[...], avg)
    # model[3:6]: Linear(no bias) -> GroupNorm -> LeakyReLU
    h = _leaky(_group_norm(
        jnp.dot(h.astype(bf16), w2_ref[...], preferred_element_type=f32),
        gn2_w_ref[...], gn2_b_ref[...], avg))
    # model[6]: final Linear; columns pre-reordered to
    # [nc(L) | rewards | dones | nm(H) | code_f | code_i | mem_f | mem_i],
    # dones affine already folded.
    out = jnp.dot(h.astype(bf16), w3_ref[...], preferred_element_type=f32) + b3_ref[...]

    P = L + 2 + H
    lin = out[:, :P]
    gates = jax.nn.sigmoid(out[:, P:])          # one contiguous sigmoid (all gates)
    code_f = gates[:, :L]
    code_i = gates[:, L:2 * L]
    mem_f = gates[:, 2 * L:2 * L + H]
    mem_i = gates[:, 2 * L + H:]

    code = xin[:, :L].astype(f32)               # slab starts with cur_code (offset 0)
    code_part = code_f * code + code_i * lin[:, :L]
    mem_part = mem_f * memory + mem_i * lin[:, L + 2:]

    # Assemble one lane-dense slab and do a single unmasked store.
    pieces = [code_part, lin[:, L:L + 2], mem_part]
    pad = out_ref.shape[-1] - P
    if pad:
        pieces.append(jnp.zeros((code_part.shape[0], pad), f32))
    out_ref[...] = jnp.concatenate(pieces, axis=-1)


def gang_forward(params, action_inputs, cur_code, tau, memory_init, *,
                 block_batch=2048):
    """block_batch: batch tile; 2048-4096 amortizes per-step overhead.  The
    working set is MiB-scale even at 4096, well within every generation's
    VMEM.  If the grid would be a single step, the tile is halved so the two
    v7x TensorCores both get work."""
    B = action_inputs.shape[0]
    L = cur_code.shape[-1]
    H = params["gn1_w"].shape[-1]
    OUT_PACK = L + 2 + H
    OUT_PAD = -(-OUT_PACK // 128) * 128

    # One packed input slab: [cur_code | action_inputs | tau | memory_init], bf16.
    x_in = jnp.concatenate([cur_code, action_inputs, tau, memory_init],
                           axis=-1).astype(jnp.bfloat16)
    d_full = x_in.shape[-1]

    # Batch tile: multiple of 8 sublanes, padded batch a multiple of the tile.
    b8 = -(-B // 8) * 8
    tb = max(8, min(block_batch, b8))
    tb = -(-tb // 8) * 8
    b_pad = -(-B // tb) * tb
    if b_pad // tb == 1 and b8 >= 32:
        # Give the grid 2 steps so "parallel" can split across v7x's two TCs.
        tb = -(-(b8 // 2) // 8) * 8
        b_pad = -(-B // tb) * tb
    if b_pad != B:
        x_in = jnp.pad(x_in, ((0, b_pad - B), (0, 0)))

    grid = (b_pad // tb,)

    weights = (params["w_mi"], params["gnmi_w"], params["gnmi_b"],
               params["w1x"], params["w1m"], params["b1"],
               params["gn1_w"], params["gn1_b"],
               params["w2"], params["gn2_w"], params["gn2_b"],
               params["w3"], params["b3"], params["gn_avg"])

    out = pl.pallas_call(
        functools.partial(gang_kernel, L, H),
        out_shape=jax.ShapeDtypeStruct((b_pad, OUT_PAD), jnp.float32),
        grid=grid,
        in_specs=[pl.BlockSpec((tb, d_full), lambda i: (i, 0))]
                 + [pl.BlockSpec(w.shape, lambda i: (0, 0)) for w in weights],
        out_specs=pl.BlockSpec((tb, OUT_PAD), lambda i: (i, 0)),
        compiler_params=pltpu.CompilerParams(
            dimension_semantics=("parallel",),
            vmem_limit_bytes=48 * 1024 * 1024),
    )(x_in, *weights)

    out = out[:B, :OUT_PACK]
    next_code = out[:, :L]
    rewards = out[:, L]
    dones = out[:, L + 1]
    next_memory = out[:, L + 2:]
    return next_code, rewards, dones, next_memory


# ---------------------------------------------------------------------------
# Parameter construction (torch-equivalent "raw" params) + init-time packing.
# ---------------------------------------------------------------------------
def make_params(key, L, H, A_in, D_tau):
    gain = float(np.sqrt(2.0 / (1.0 + 0.1 ** 2)))          # leaky_relu(0.1) gain
    ortho = jax.nn.initializers.orthogonal(scale=gain)
    ks = jax.random.split(key, 10)
    OUT = 3 * L + 2 + 3 * H

    def bf16_round(x):   # weights used in bf16 by the kernel; round reference copy too
        return x.astype(jnp.bfloat16).astype(jnp.float32)

    return dict(
        w_mi=bf16_round(ortho(ks[0], (L, H), jnp.float32)),
        gnmi_w=jnp.ones((1, H), jnp.float32),
        gnmi_b=jnp.zeros((1, H), jnp.float32),
        w1a=bf16_round(ortho(ks[1], (A_in, H), jnp.float32)),
        w1c=bf16_round(ortho(ks[2], (L, H), jnp.float32)),
        w1m=bf16_round(ortho(ks[3], (H, H), jnp.float32)),
        w1t=bf16_round(ortho(ks[4], (D_tau, H), jnp.float32)),
        b1=(jax.random.uniform(ks[5], (1, H), jnp.float32) - 0.5) * 0.1,
        gn1_w=jnp.ones((1, H), jnp.float32),
        gn1_b=jnp.zeros((1, H), jnp.float32),
        w2=bf16_round(ortho(ks[6], (H, H), jnp.float32)),
        gn2_w=jnp.ones((1, H), jnp.float32),
        gn2_b=jnp.zeros((1, H), jnp.float32),
        w3=bf16_round(ortho(ks[7], (H, OUT), jnp.float32)),
        b3=(jax.random.uniform(ks[8], (1, OUT), jnp.float32) - 0.5) * 0.1,
    )


def pack_params(raw):
    """Init-time transforms: stack layer-1 weight over the packed input slab,
    zero-pad the memory_init weight to the same slab, fold tau/dones affines,
    reorder W3 columns, build the fused GroupNorm averaging matrix, bf16 weights."""
    bf16 = jnp.bfloat16
    L, H = raw["w1c"].shape
    A_in = raw["w1a"].shape[0]
    D_tau = raw["w1t"].shape[0]
    d_in = L + A_in + D_tau                       # [code | action | tau]
    gsize = H // GROUPS

    # layer 1 over the slab [code | action | tau | minit]; (tau*2-1)@w1t folded
    # as tau@(2*w1t) with bias shift -sum(w1t); minit rows are zero.
    w1x = jnp.concatenate([raw["w1c"], raw["w1a"], 2.0 * raw["w1t"],
                           jnp.zeros((L, H), jnp.float32)], axis=0)
    b1 = raw["b1"] - jnp.sum(raw["w1t"], axis=0, keepdims=True)

    # memory_init weight zero-padded so it consumes the same slab.
    w_mi = jnp.concatenate([jnp.zeros((d_in, H), jnp.float32), raw["w_mi"]], axis=0)

    # final layer: reorder columns from torch split order
    #   [nc | code_f | code_i | rewards | dones | nm | mem_f | mem_i]
    # to [nc | rewards | dones | nm | code_f | code_i | mem_f | mem_i].
    sizes = [L, L, L, 1, 1, H, H, H]
    offs = np.concatenate([[0], np.cumsum(sizes)])
    blk = lambda k: np.arange(offs[k], offs[k + 1])
    perm = np.concatenate([blk(0), blk(3), blk(4), blk(5),
                           blk(1), blk(2), blk(6), blk(7)])
    w3 = raw["w3"][:, perm]
    b3 = raw["b3"][:, perm]
    d = L + 1                                     # dones column in the new layout
    w3 = w3.at[:, d].set(w3[:, d] * 0.5)          # fold dones*0.5+0.5
    b3 = b3.at[:, d].set(b3[:, d] * 0.5 + 0.5)

    # Fused GroupNorm block-averaging matrix A = gmat_s @ gmat_t.
    gn_avg = jnp.kron(jnp.eye(GROUPS, dtype=jnp.float32),
                      jnp.ones((gsize, gsize), jnp.float32)) / float(gsize)

    return dict(
        w_mi=w_mi.astype(bf16),
        gnmi_w=raw["gnmi_w"], gnmi_b=raw["gnmi_b"],
        w1x=w1x.astype(bf16), w1m=raw["w1m"].astype(bf16), b1=b1,
        gn1_w=raw["gn1_w"], gn1_b=raw["gn1_b"],
        w2=raw["w2"].astype(bf16),
        gn2_w=raw["gn2_w"], gn2_b=raw["gn2_b"],
        w3=w3.astype(bf16), b3=b3,
        gn_avg=gn_avg,
    )


# ---------------------------------------------------------------------------
# Pure-JAX f32 reference (mirrors torch.nn.GroupNorm / Sequential exactly).
# ---------------------------------------------------------------------------
def gang_reference(params, ai, code, tau, minit, L, H):
    def gn(x, w, b):
        B, C = x.shape
        xg = x.reshape(B, GROUPS, C // GROUPS)
        mean = xg.mean(-1, keepdims=True)
        var = ((xg - mean) ** 2).mean(-1, keepdims=True)
        xn = ((xg - mean) / jnp.sqrt(var + EPS)).reshape(B, C)
        return xn * w + b

    leaky = lambda x: jnp.where(x > 0, x, 0.1 * x)
    memory = leaky(gn(minit @ params["w_mi"], params["gnmi_w"], params["gnmi_b"]))
    h = (ai @ params["w1a"] + code @ params["w1c"] + memory @ params["w1m"]
         + (tau * 2 - 1) @ params["w1t"] + params["b1"])
    h = gn(leaky(h), params["gn1_w"], params["gn1_b"])
    h = leaky(gn(h @ params["w2"], params["gn2_w"], params["gn2_b"]))
    out = h @ params["w3"] + params["b3"]

    next_code_raw = out[:, 0:L]
    code_f = jax.nn.sigmoid(out[:, L:2 * L])
    code_i = jax.nn.sigmoid(out[:, 2 * L:3 * L])
    rewards = out[:, 3 * L]
    dones = out[:, 3 * L + 1] * 0.5 + 0.5
    next_mem_raw = out[:, 3 * L + 2:3 * L + 2 + H]
    mem_f = jax.nn.sigmoid(out[:, 3 * L + 2 + H:3 * L + 2 + 2 * H])
    mem_i = jax.nn.sigmoid(out[:, 3 * L + 2 + 2 * H:])
    next_code = code_f * code + code_i * next_code_raw
    next_memory = mem_f * memory + mem_i * next_mem_raw
    return next_code, rewards, dones, next_memory


if __name__ == "__main__":
    # Small, module-consistent shapes.
    L = 8          # latent_input_code_size
    H = 32         # hidden_size (divisible by 4 for GroupNorm(4, H))
    A_IN = 6       # action_pd.input_vector_len
    A_PROB = 5     # action_pd.prob_vector_len
    D_TAU = L + A_PROB + 3  # tau dim so cat(...) matches the Linear input size

    key = jax.random.PRNGKey(0)
    kp, kd = jax.random.split(key)
    raw = make_params(kp, L, H, A_IN, D_TAU)
    packed = pack_params(raw)

    def bf16_round(x):
        return x.astype(jnp.bfloat16).astype(jnp.float32)

    def run_case(seed_key, B, block_batch):
        ka, kc, kt, km = jax.random.split(seed_key, 4)
        # Round inputs to bf16-representable values so kernel (bf16 slab) and
        # f32 reference see identical inputs; remaining differences come only
        # from the kernel's bf16 MXU feed of intermediate activations.
        ai = bf16_round(jax.random.normal(ka, (B, A_IN), jnp.float32))
        code = bf16_round(jax.random.normal(kc, (B, L), jnp.float32))
        tau = bf16_round(jax.random.uniform(kt, (B, D_TAU), jnp.float32))
        minit = bf16_round(jax.random.normal(km, (B, L), jnp.float32))

        nc, rr, dd, nm = jax.block_until_ready(
            gang_forward(packed, ai, code, tau, minit, block_batch=block_batch))

        rc, rr_ref, rd_ref, rm = gang_reference(raw, ai, code, tau, minit, L, H)
        assert nc.shape == (B, L) and nm.shape == (B, H)
        assert rr.shape == (B,) and dd.shape == (B,)
        # Tolerances reflect the bf16 MXU feed of intermediate activations
        # (f32 accumulation); structural/packing bugs produce O(1) errors.
        tol = dict(rtol=5e-2, atol=1e-1)
        np.testing.assert_allclose(np.asarray(nc), np.asarray(rc), **tol)
        np.testing.assert_allclose(np.asarray(rr), np.asarray(rr_ref), **tol)
        np.testing.assert_allclose(np.asarray(dd), np.asarray(rd_ref), **tol)
        np.testing.assert_allclose(np.asarray(nm), np.asarray(rm), **tol)

    k1, k2, k3 = jax.random.split(kd, 3)
    # single-tile case (grid = 1)
    run_case(k1, B=8, block_batch=2048)
    # multi-tile + padded-remainder case (B=20 -> padded to 24, 3 grid steps)
    run_case(k2, B=20, block_batch=8)
    # default tile with grid-splitting heuristic (B=40 -> 2 steps of 24, pad to 48)
    run_case(k3, B=40, block_batch=2048)

    print("KERNEL_OK")
</pallas_src>

<mosaic_0001>
module attributes {stable_mosaic.version = 11 : i64} {
  func.func @gang_kernel(%arg0: i32, %arg1: memref<8x38xbf16, #tpu.memory_space<vmem>>, %arg2: memref<38x32xbf16, #tpu.memory_space<vmem>>, %arg3: memref<1x32xf32, #tpu.memory_space<vmem>>, %arg4: memref<1x32xf32, #tpu.memory_space<vmem>>, %arg5: memref<38x32xbf16, #tpu.memory_space<vmem>>, %arg6: memref<32x32xbf16, #tpu.memory_space<vmem>>, %arg7: memref<1x32xf32, #tpu.memory_space<vmem>>, %arg8: memref<1x32xf32, #tpu.memory_space<vmem>>, %arg9: memref<1x32xf32, #tpu.memory_space<vmem>>, %arg10: memref<32x32xbf16, #tpu.memory_space<vmem>>, %arg11: memref<1x32xf32, #tpu.memory_space<vmem>>, %arg12: memref<1x32xf32, #tpu.memory_space<vmem>>, %arg13: memref<32x122xbf16, #tpu.memory_space<vmem>>, %arg14: memref<1x122xf32, #tpu.memory_space<vmem>>, %arg15: memref<32x32xf32, #tpu.memory_space<vmem>>, %arg16: memref<8x128xf32, #tpu.memory_space<vmem>>) attributes {dimension_semantics = [#tpu.dimension_semantics<parallel>], iteration_bounds = array<i64: 1>, scalar_prefetch = 0 : i64, scratch_operands = 0 : i64, tpu.core_type = #tpu.core_type<tc>, window_params = [{transform_indices = @transform_0, window_bounds = array<i64: 8, 38>}, {pipeline_mode = #tpu.pipeline_mode<synchronous>, transform_indices = @transform_1, window_bounds = array<i64: 38, 32>}, {pipeline_mode = #tpu.pipeline_mode<synchronous>, transform_indices = @transform_2, window_bounds = array<i64: 1, 32>}, {pipeline_mode = #tpu.pipeline_mode<synchronous>, transform_indices = @transform_3, window_bounds = array<i64: 1, 32>}, {pipeline_mode = #tpu.pipeline_mode<synchronous>, transform_indices = @transform_4, window_bounds = array<i64: 38, 32>}, {pipeline_mode = #tpu.pipeline_mode<synchronous>, transform_indices = @transform_5, window_bounds = array<i64: 32, 32>}, {pipeline_mode = #tpu.pipeline_mode<synchronous>, transform_indices = @transform_6, window_bounds = array<i64: 1, 32>}, {pipeline_mode = #tpu.pipeline_mode<synchronous>, transform_indices = @transform_7, window_bounds = array<i64: 1, 32>}, {pipeline_mode = #tpu.pipeline_mode<synchronous>, transform_indices = @transform_8, window_bounds = array<i64: 1, 32>}, {pipeline_mode = #tpu.pipeline_mode<synchronous>, transform_indices = @transform_9, window_bounds = array<i64: 32, 32>}, {pipeline_mode = #tpu.pipeline_mode<synchronous>, transform_indices = @transform_10, window_bounds = array<i64: 1, 32>}, {pipeline_mode = #tpu.pipeline_mode<synchronous>, transform_indices = @transform_11, window_bounds = array<i64: 1, 32>}, {pipeline_mode = #tpu.pipeline_mode<synchronous>, transform_indices = @transform_12, window_bounds = array<i64: 32, 122>}, {pipeline_mode = #tpu.pipeline_mode<synchronous>, transform_indices = @transform_13, window_bounds = array<i64: 1, 122>}, {pipeline_mode = #tpu.pipeline_mode<synchronous>, transform_indices = @transform_14, window_bounds = array<i64: 32, 32>}, {transform_indices = @transform_15, window_bounds = array<i64: 8, 128>}]} {
    %c0 = arith.constant 0 : index
    %c0_0 = arith.constant 0 : index
    %0 = vector.load %arg15[%c0, %c0_0] : memref<32x32xf32, #tpu.memory_space<vmem>>, vector<32x32xf32>
    %c0_1 = arith.constant 0 : index
    %c0_2 = arith.constant 0 : index
    %1 = vector.load %arg1[%c0_1, %c0_2] : memref<8x38xbf16, #tpu.memory_space<vmem>>, vector<8x38xbf16>
    %c0_3 = arith.constant 0 : index
    %c0_4 = arith.constant 0 : index
    %2 = vector.load %arg2[%c0_3, %c0_4] : memref<38x32xbf16, #tpu.memory_space<vmem>>, vector<38x32xbf16>
    %cst = arith.constant dense<0.000000e+00> : vector<8x32xf32>
    %3 = tpu.matmul %1, %2, %cst {dimension_numbers = #tpu.dot_dimension_numbers<[1], [0], [0], [1], [0, 0, 1, 1], [], []>} : vector<8x38xbf16>, vector<38x32xbf16>, vector<8x32xf32> -> vector<8x32xf32>
    %c0_5 = arith.constant 0 : index
    %c0_6 = arith.constant 0 : index
    %4 = vector.load %arg3[%c0_5, %c0_6] : memref<1x32xf32, #tpu.memory_space<vmem>>, vector<1x32xf32>
    %c0_7 = arith.constant 0 : index
    %c0_8 = arith.constant 0 : index
    %5 = vector.load %arg4[%c0_7, %c0_8] : memref<1x32xf32, #tpu.memory_space<vmem>>, vector<1x32xf32>
    %cst_9 = arith.constant dense<0.000000e+00> : vector<8x32xf32>
    %6 = tpu.matmul %3, %0, %cst_9 {dimension_numbers = #tpu.dot_dimension_numbers<[1], [0], [0], [1], [0, 0, 1, 1], [], []>} : vector<8x32xf32>, vector<32x32xf32>, vector<8x32xf32> -> vector<8x32xf32>
    %7 = arith.mulf %3, %3 : vector<8x32xf32>
    %cst_10 = arith.constant dense<0.000000e+00> : vector<8x32xf32>
    %8 = tpu.matmul %7, %0, %cst_10 {dimension_numbers = #tpu.dot_dimension_numbers<[1], [0], [0], [1], [0, 0, 1, 1], [], []>} : vector<8x32xf32>, vector<32x32xf32>, vector<8x32xf32> -> vector<8x32xf32>
    %9 = arith.mulf %6, %6 : vector<8x32xf32>
    %10 = arith.subf %8, %9 : vector<8x32xf32>
    %11 = arith.subf %3, %6 : vector<8x32xf32>
    %cst_11 = arith.constant 9.99999974E-6 : f32
    %12 = vector.broadcast %cst_11 : f32 to vector<8x32xf32>
    %13 = arith.addf %10, %12 : vector<8x32xf32>
    %14 = math.rsqrt %13 : vector<8x32xf32>
    %15 = arith.mulf %11, %14 : vector<8x32xf32>
    %16 = vector.broadcast %4 : vector<1x32xf32> to vector<8x32xf32>
    %17 = arith.mulf %15, %16 : vector<8x32xf32>
    %18 = vector.broadcast %5 : vector<1x32xf32> to vector<8x32xf32>
    %19 = arith.addf %17, %18 : vector<8x32xf32>
    %cst_12 = arith.constant 0.000000e+00 : f32
    %20 = vector.broadcast %cst_12 : f32 to vector<8x32xf32>
    %21 = arith.cmpf ogt, %19, %20 : vector<8x32xf32>
    %cst_13 = arith.constant 1.000000e-01 : f32
    %22 = vector.broadcast %cst_13 : f32 to vector<8x32xf32>
    %23 = arith.mulf %22, %19 : vector<8x32xf32>
    %24 = arith.select %21, %19, %23 : vector<8x32xi1>, vector<8x32xf32>
    %c0_14 = arith.constant 0 : index
    %c0_15 = arith.constant 0 : index
    %25 = vector.load %arg5[%c0_14, %c0_15] : memref<38x32xbf16, #tpu.memory_space<vmem>>, vector<38x32xbf16>
    %cst_16 = arith.constant dense<0.000000e+00> : vector<8x32xf32>
    %26 = tpu.matmul %1, %25, %cst_16 {dimension_numbers = #tpu.dot_dimension_numbers<[1], [0], [0], [1], [0, 0, 1, 1], [], []>} : vector<8x38xbf16>, vector<38x32xbf16>, vector<8x32xf32> -> vector<8x32xf32>
    %27 = arith.truncf %24 : vector<8x32xf32> to vector<8x32xbf16>
    %c0_17 = arith.constant 0 : index
    %c0_18 = arith.constant 0 : index
    %28 = vector.load %arg6[%c0_17, %c0_18] : memref<32x32xbf16, #tpu.memory_space<vmem>>, vector<32x32xbf16>
    %cst_19 = arith.constant dense<0.000000e+00> : vector<8x32xf32>
    %29 = tpu.matmul %27, %28, %cst_19 {dimension_numbers = #tpu.dot_dimension_numbers<[1], [0], [0], [1], [0, 0, 1, 1], [], []>} : vector<8x32xbf16>, vector<32x32xbf16>, vector<8x32xf32> -> vector<8x32xf32>
    %30 = arith.addf %26, %29 : vector<8x32xf32>
    %c0_20 = arith.constant 0 : index
    %c0_21 = arith.constant 0 : index
    %31 = vector.load %arg7[%c0_20, %c0_21] : memref<1x32xf32, #tpu.memory_space<vmem>>, vector<1x32xf32>
    %32 = vector.broadcast %31 : vector<1x32xf32> to vector<8x32xf32>
    %33 = arith.addf %30, %32 : vector<8x32xf32>
    %cst_22 = arith.constant 0.000000e+00 : f32
    %34 = vector.broadcast %cst_22 : f32 to vector<8x32xf32>
    %35 = arith.cmpf ogt, %33, %34 : vector<8x32xf32>
    %cst_23 = arith.constant 1.000000e-01 : f32
    %36 = vector.broadcast %cst_23 : f32 to vector<8x32xf32>
    %37 = arith.mulf %36, %33 : vector<8x32xf32>
    %38 = arith.select %35, %33, %37 : vector<8x32xi1>, vector<8x32xf32>
    %c0_24 = arith.constant 0 : index
    %c0_25 = arith.constant 0 : index
    %39 = vector.load %arg8[%c0_24, %c0_25] : memref<1x32xf32, #tpu.memory_space<vmem>>, vector<1x32xf32>
    %c0_26 = arith.constant 0 : index
    %c0_27 = arith.constant 0 : index
    %40 = vector.load %arg9[%c0_26, %c0_27] : memref<1x32xf32, #tpu.memory_space<vmem>>, vector<1x32xf32>
    %cst_28 = arith.constant dense<0.000000e+00> : vector<8x32xf32>
    %41 = tpu.matmul %38, %0, %cst_28 {dimension_numbers = #tpu.dot_dimension_numbers<[1], [0], [0], [1], [0, 0, 1, 1], [], []>} : vector<8x32xf32>, vector<32x32xf32>, vector<8x32xf32> -> vector<8x32xf32>
    %42 = arith.mulf %38, %38 : vector<8x32xf32>
    %cst_29 = arith.constant dense<0.000000e+00> : vector<8x32xf32>
    %43 = tpu.matmul %42, %0, %cst_29 {dimension_numbers = #tpu.dot_dimension_numbers<[1], [0], [0], [1], [0, 0, 1, 1], [], []>} : vector<8x32xf32>, vector<32x32xf32>, vector<8x32xf32> -> vector<8x32xf32>
    %44 = arith.mulf %41, %41 : vector<8x32xf32>
    %45 = arith.subf %43, %44 : vector<8x32xf32>
    %46 = arith.subf %38, %41 : vector<8x32xf32>
    %cst_30 = arith.constant 9.99999974E-6 : f32
    %47 = vector.broadcast %cst_30 : f32 to vector<8x32xf32>
    %48 = arith.addf %45, %47 : vector<8x32xf32>
    %49 = math.rsqrt %48 : vector<8x32xf32>
    %50 = arith.mulf %46, %49 : vector<8x32xf32>
    %51 = vector.broadcast %39 : vector<1x32xf32> to vector<8x32xf32>
    %52 = arith.mulf %50, %51 : vector<8x32xf32>
    %53 = vector.broadcast %40 : vector<1x32xf32> to vector<8x32xf32>
    %54 = arith.addf %52, %53 : vector<8x32xf32>
    %55 = arith.truncf %54 : vector<8x32xf32> to vector<8x32xbf16>
    %c0_31 = arith.constant 0 : index
    %c0_32 = arith.constant 0 : index
    %56 = vector.load %arg10[%c0_31, %c0_32] : memref<32x32xbf16, #tpu.memory_space<vmem>>, vector<32x32xbf16>
    %cst_33 = arith.constant dense<0.000000e+00> : vector<8x32xf32>
    %57 = tpu.matmul %55, %56, %cst_33 {dimension_numbers = #tpu.dot_dimension_numbers<[1], [0], [0], [1], [0, 0, 1, 1], [], []>} : vector<8x32xbf16>, vector<32x32xbf16>, vector<8x32xf32> -> vector<8x32xf32>
    %c0_34 = arith.constant 0 : index
    %c0_35 = arith.constant 0 : index
    %58 = vector.load %arg11[%c0_34, %c0_35] : memref<1x32xf32, #tpu.memory_space<vmem>>, vector<1x32xf32>
    %c0_36 = arith.constant 0 : index
    %c0_37 = arith.constant 0 : index
    %59 = vector.load %arg12[%c0_36, %c0_37] : memref<1x32xf32, #tpu.memory_space<vmem>>, vector<1x32xf32>
    %cst_38 = arith.constant dense<0.000000e+00> : vector<8x32xf32>
    %60 = tpu.matmul %57, %0, %cst_38 {dimension_numbers = #tpu.dot_dimension_numbers<[1], [0], [0], [1], [0, 0, 1, 1], [], []>} : vector<8x32xf32>, vector<32x32xf32>, vector<8x32xf32> -> vector<8x32xf32>
    %61 = arith.mulf %57, %57 : vector<8x32xf32>
    %cst_39 = arith.constant dense<0.000000e+00> : vector<8x32xf32>
    %62 = tpu.matmul %61, %0, %cst_39 {dimension_numbers = #tpu.dot_dimension_numbers<[1], [0], [0], [1], [0, 0, 1, 1], [], []>} : vector<8x32xf32>, vector<32x32xf32>, vector<8x32xf32> -> vector<8x32xf32>
    %63 = arith.mulf %60, %60 : vector<8x32xf32>
    %64 = arith.subf %62, %63 : vector<8x32xf32>
    %65 = arith.subf %57, %60 : vector<8x32xf32>
    %cst_40 = arith.constant 9.99999974E-6 : f32
    %66 = vector.broadcast %cst_40 : f32 to vector<8x32xf32>
    %67 = arith.addf %64, %66 : vector<8x32xf32>
    %68 = math.rsqrt %67 : vector<8x32xf32>
    %69 = arith.mulf %65, %68 : vector<8x32xf32>
    %70 = vector.broadcast %58 : vector<1x32xf32> to vector<8x32xf32>
    %71 = arith.mulf %69, %70 : vector<8x32xf32>
    %72 = vector.broadcast %59 : vector<1x32xf32> to vector<8x32xf32>
    %73 = arith.addf %71, %72 : vector<8x32xf32>
    %cst_41 = arith.constant 0.000000e+00 : f32
    %74 = vector.broadcast %cst_41 : f32 to vector<8x32xf32>
    %75 = arith.cmpf ogt, %73, %74 : vector<8x32xf32>
    %cst_42 = arith.constant 1.000000e-01 : f32
    %76 = vector.broadcast %cst_42 : f32 to vector<8x32xf32>
    %77 = arith.mulf %76, %73 : vector<8x32xf32>
    %78 = arith.select %75, %73, %77 : vector<8x32xi1>, vector<8x32xf32>
    %79 = arith.truncf %78 : vector<8x32xf32> to vector<8x32xbf16>
    %c0_43 = arith.constant 0 : index
    %c0_44 = arith.constant 0 : index
    %80 = vector.load %arg13[%c0_43, %c0_44] : memref<32x122xbf16, #tpu.memory_space<vmem>>, vector<32x122xbf16>
    %cst_45 = arith.constant dense<0.000000e+00> : vector<8x122xf32>
    %81 = tpu.matmul %79, %80, %cst_45 {dimension_numbers = #tpu.dot_dimension_numbers<[1], [0], [0], [1], [0, 0, 1, 1], [], []>} : vector<8x32xbf16>, vector<32x122xbf16>, vector<8x122xf32> -> vector<8x122xf32>
    %c0_46 = arith.constant 0 : index
    %c0_47 = arith.constant 0 : index
    %82 = vector.load %arg14[%c0_46, %c0_47] : memref<1x122xf32, #tpu.memory_space<vmem>>, vector<1x122xf32>
    %83 = vector.broadcast %82 : vector<1x122xf32> to vector<8x122xf32>
    %84 = arith.addf %81, %83 : vector<8x122xf32>
    %85 = vector.extract_strided_slice %84 {offsets = [0, 0], sizes = [8, 42], strides = [1, 1]} : vector<8x122xf32> to vector<8x42xf32>
    %86 = vector.extract_strided_slice %84 {offsets = [0, 42], sizes = [8, 80], strides = [1, 1]} : vector<8x122xf32> to vector<8x80xf32>
    %87 = arith.negf %86 : vector<8x80xf32>
    %88 = math.exp %87 : vector<8x80xf32>
    %cst_48 = arith.constant 1.000000e+00 : f32
    %89 = vector.broadcast %cst_48 : f32 to vector<8x80xf32>
    %90 = arith.addf %89, %88 : vector<8x80xf32>
    %91 = arith.divf %89, %90 : vector<8x80xf32>
    %92 = vector.extract_strided_slice %91 {offsets = [0, 0], sizes = [8, 8], strides = [1, 1]} : vector<8x80xf32> to vector<8x8xf32>
    %93 = vector.extract_strided_slice %91 {offsets = [0, 8], sizes = [8, 8], strides = [1, 1]} : vector<8x80xf32> to vector<8x8xf32>
    %94 = vector.extract_strided_slice %91 {offsets = [0, 16], sizes = [8, 32], strides = [1, 1]} : vector<8x80xf32> to vector<8x32xf32>
    %95 = vector.extract_strided_slice %91 {offsets = [0, 48], sizes = [8, 32], strides = [1, 1]} : vector<8x80xf32> to vector<8x32xf32>
    %96 = vector.extract_strided_slice %1 {offsets = [0, 0], sizes = [8, 8], strides = [1, 1]} : vector<8x38xbf16> to vector<8x8xbf16>
    %97 = arith.extf %96 : vector<8x8xbf16> to vector<8x8xf32>
    %98 = arith.mulf %92, %97 : vector<8x8xf32>
    %99 = vector.extract_strided_slice %85 {offsets = [0, 0], sizes = [8, 8], strides = [1, 1]} : vector<8x42xf32> to vector<8x8xf32>
    %100 = arith.mulf %93, %99 : vector<8x8xf32>
    %101 = arith.addf %98, %100 : vector<8x8xf32>
    %102 = arith.mulf %94, %24 : vector<8x32xf32>
    %103 = vector.extract_strided_slice %85 {offsets = [0, 10], sizes = [8, 32], strides = [1, 1]} : vector<8x42xf32> to vector<8x32xf32>
    %104 = arith.mulf %95, %103 : vector<8x32xf32>
    %105 = arith.addf %102, %104 : vector<8x32xf32>
    %106 = vector.extract_strided_slice %85 {offsets = [0, 8], sizes = [8, 2], strides = [1, 1]} : vector<8x42xf32> to vector<8x2xf32>
    %cst_49 = arith.constant 0.000000e+00 : f32
    %107 = vector.broadcast %cst_49 : f32 to vector<8x86xf32>
    %108 = tpu.concatenate %101, %106, %105, %107 in 1 : vector<8x8xf32>, vector<8x2xf32>, vector<8x32xf32>, vector<8x86xf32> -> vector<8x128xf32>
    %c0_50 = arith.constant 0 : index
    %c0_51 = arith.constant 0 : index
    %109 = vector.load %arg16[%c0_50, %c0_51] : memref<8x128xf32, #tpu.memory_space<vmem>>, vector<8x128xf32>
    tpu.vector_store %arg16[%c0_50, %c0_51], %108 {strides = array<i32>} : memref<8x128xf32, #tpu.memory_space<vmem>>, vector<8x128xf32>,
    return
  }
  func.func @transform_0(%arg0: i32) -> (i32, i32) {
    %c0_i32 = arith.constant 0 : i32
    %c0_i32_0 = arith.constant 0 : i32
    return %arg0, %c0_i32 : i32, i32
  }
  func.func @transform_1(%arg0: i32) -> (i32, i32) {
    %c0_i32 = arith.constant 0 : i32
    %c0_i32_0 = arith.constant 0 : i32
    %c0_i32_1 = arith.constant 0 : i32
    return %c0_i32, %c0_i32_0 : i32, i32
  }
  func.func @transform_2(%arg0: i32) -> (i32, i32) {
    %c0_i32 = arith.constant 0 : i32
    %c0_i32_0 = arith.constant 0 : i32
    %c0_i32_1 = arith.constant 0 : i32
    return %c0_i32, %c0_i32_0 : i32, i32
  }
  func.func @transform_3(%arg0: i32) -> (i32, i32) {
    %c0_i32 = arith.constant 0 : i32
    %c0_i32_0 = arith.constant 0 : i32
    %c0_i32_1 = arith.constant 0 : i32
    return %c0_i32, %c0_i32_0 : i32, i32
  }
  func.func @transform_4(%arg0: i32) -> (i32, i32) {
    %c0_i32 = arith.constant 0 : i32
    %c0_i32_0 = arith.constant 0 : i32
    %c0_i32_1 = arith.constant 0 : i32
    return %c0_i32, %c0_i32_0 : i32, i32
  }
  func.func @transform_5(%arg0: i32) -> (i32, i32) {
    %c0_i32 = arith.constant 0 : i32
    %c0_i32_0 = arith.constant 0 : i32
    %c0_i32_1 = arith.constant 0 : i32
    return %c0_i32, %c0_i32_0 : i32, i32
  }
  func.func @transform_6(%arg0: i32) -> (i32, i32) {
    %c0_i32 = arith.constant 0 : i32
    %c0_i32_0 = arith.constant 0 : i32
    %c0_i32_1 = arith.constant 0 : i32
    return %c0_i32, %c0_i32_0 : i32, i32
  }
  func.func @transform_7(%arg0: i32) -> (i32, i32) {
    %c0_i32 = arith.constant 0 : i32
    %c0_i32_0 = arith.constant 0 : i32
    %c0_i32_1 = arith.constant 0 : i32
    return %c0_i32, %c0_i32_0 : i32, i32
  }
  func.func @transform_8(%arg0: i32) -> (i32, i32) {
    %c0_i32 = arith.constant 0 : i32
    %c0_i32_0 = arith.constant 0 : i32
    %c0_i32_1 = arith.constant 0 : i32
    return %c0_i32, %c0_i32_0 : i32, i32
  }
  func.func @transform_9(%arg0: i32) -> (i32, i32) {
    %c0_i32 = arith.constant 0 : i32
    %c0_i32_0 = arith.constant 0 : i32
    %c0_i32_1 = arith.constant 0 : i32
    return %c0_i32, %c0_i32_0 : i32, i32
  }
  func.func @transform_10(%arg0: i32) -> (i32, i32) {
    %c0_i32 = arith.constant 0 : i32
    %c0_i32_0 = arith.constant 0 : i32
    %c0_i32_1 = arith.constant 0 : i32
    return %c0_i32, %c0_i32_0 : i32, i32
  }
  func.func @transform_11(%arg0: i32) -> (i32, i32) {
    %c0_i32 = arith.constant 0 : i32
    %c0_i32_0 = arith.constant 0 : i32
    %c0_i32_1 = arith.constant 0 : i32
    return %c0_i32, %c0_i32_0 : i32, i32
  }
  func.func @transform_12(%arg0: i32) -> (i32, i32) {
    %c0_i32 = arith.constant 0 : i32
    %c0_i32_0 = arith.constant 0 : i32
    %c0_i32_1 = arith.constant 0 : i32
    return %c0_i32, %c0_i32_0 : i32, i32
  }
  func.func @transform_13(%arg0: i32) -> (i32, i32) {
    %c0_i32 = arith.constant 0 : i32
    %c0_i32_0 = arith.constant 0 : i32
    %c0_i32_1 = arith.constant 0 : i32
    return %c0_i32, %c0_i32_0 : i32, i32
  }
  func.func @transform_14(%arg0: i32) -> (i32, i32) {
    %c0_i32 = arith.constant 0 : i32
    %c0_i32_0 = arith.constant 0 : i32
    %c0_i32_1 = arith.constant 0 : i32
    return %c0_i32, %c0_i32_0 : i32, i32
  }
  func.func @transform_15(%arg0: i32) -> (i32, i32) {
    %c0_i32 = arith.constant 0 : i32
    %c0_i32_0 = arith.constant 0 : i32
    return %arg0, %c0_i32 : i32, i32
  }
}

</mosaic_0001>

<bundles_post_ra>
// kernel: tpu_custom_call.1
= control target key start
LH: loop header
LB: loop body
LE: loop exit
PB: predicated region body
PF: predicated region fallthrough
CT: control target
= control target key end

     0   :  { %20 = vsyncpa [#allocation3], 0  ;;  %s1553_s0 = inlined_call_operand.hbm [shape: bf16[8,38], index: 0, kind: input, shape index: {}]   ;;  %s1554_s1 = inlined_call_operand.vmem [shape: bf16[38,32], index: 1, kind: input, shape index: {}]   ;;  %s1555_s2 = inlined_call_operand.vmem [shape: f32[1,32], index: 2, kind: input, shape index: {}]   ;;  %s1556_s3 = inlined_call_operand.vmem [shape: f32[1,32], index: 3, kind: input, shape index: {}]   ;;  %s1557_s4 = inlined_call_operand.vmem [shape: bf16[38,32], index: 4, kind: input, shape index: {}]   ;;  %s1558_s5 = inlined_call_operand.vmem [shape: bf16[32,32], index: 5, kind: input, shape index: {}]   ;;  %s1559_s6 = inlined_call_operand.vmem [shape: f32[1,32], index: 6, kind: input, shape index: {}]   ;;  %s1560_s7 = inlined_call_operand.vmem [shape: f32[1,32], index: 7, kind: input, shape index: {}]   ;;  %s1561_s8 = inlined_call_operand.vmem [shape: f32[1,32], index: 8, kind: input, shape index: {}]   ;;  %s1562_s9 = inlined_call_operand.vmem [shape: bf16[32,32], index: 9, kind: input, shape index: {}]   ;;  %s1563_s10 = inlined_call_operand.vmem [shape: f32[1,32], index: 10, kind: input, shape index: {}]   ;;  %s1564_s11 = inlined_call_operand.vmem [shape: f32[1,32], index: 11, kind: input, shape index: {}]   ;;  %s1565_s12 = inlined_call_operand.vmem [shape: bf16[32,122], index: 12, kind: input, shape index: {}]   ;;  %s1566_s13 = inlined_call_operand.vmem [shape: f32[1,122], index: 13, kind: input, shape index: {}]   ;;  %s1567_s14 = inlined_call_operand.vmem [shape: f32[32,32], index: 14, kind: input, shape index: {}]   ;;  %s1568_s15 = inlined_call_operand.hbm [shape: f32[8,128], index: 15, kind: output, shape index: {}]  }
   0x1   :  { %21 = vsyncpa [#allocation4], 0  ;;  %s1285_s18 = smov [#allocation2]   ;;  %s1237_s22 = scalar_lea.hbm %s1553_s0, 64 }
   0x2   :  { %s28_s19 = sshll.u32 %s1285_s18, 4  ;;  %p1238_p0 = scmp.ne.s32.totalorder %s1553_s0, %s1237_s22  ;;  %s29_s19 = int_to_ptr.vmem [resolvable:$true] %s28_s19 }
   0x3   :  { %p1241_p1 = scmp.lt.u32.totalorder %s1237_s22, %s1553_s0 }
   0x5   :  { %p1243_p2 = pnand %p1241_p1, %p1238_p0 }
   0x7   :  { %1246 = shalt.err (!%p1243_p2)
}
   0x8   :  { %s1247_s27 = scalar_lea.vmem %s29_s19, 64  ;;  %p1252_p4 = scmp.lt.s32.totalorder %s29_s19, %s29_s19 }
   0x9   :  { %p1248_p3 = scmp.ne.s32.totalorder %s29_s19, %s1247_s27  ;;  %p1253_p5 = scmp.lt.s32.totalorder %s1247_s27, %s1247_s27 }
   0xb   :  { %p1254_p6 = por %p1253_p5, %p1252_p4 }
   0xd   :  { %p1255_p7 = pnand %p1254_p6, %p1248_p3 }
   0xf   :  { %1258 = shalt.err (!%p1255_p7)
}
  0x10   :  { %31 = dma.hbm_to_vmem [thread:$0]  %s1553_s0, 64, %s29_s19, [#allocation3]  }
  0x11   :  { %1281 = dma.done.wait [#allocation3], 64  }
  0x12   :  { %1282 = vsyncadd [#allocation3], 4294967232  ;;  %v1286_v0 = vmov 0.0   ;;  %vm1287_vm0 = vmmov 0   ;;  %v1288_v1 = vmov 0.0|0.0   ;;  %v1215_v2 = vld [vmem:[%s1554_s1] sm:$0xff]  }
  0x13   :  { %1057 = vmatprep.subr.bf16.mxu0 %v1286_v0  ;;  %1063 = vmatprep.mubr.msk.bf16.mxu0 %vm1287_vm0, %v1286_v0  ;;  %v1216_v3 = vld [vmem:[%s1554_s1 + $0x8] sm:$0xff]   ;;  %vm93_vm1 = vcmask 1042432   ;;  %v1217_v4 = vld [vmem:[%s1554_s1 + $0x10] ss:$0 sps:$4 sm:$0x77]   ;;  %v64_v5 = vld [vmem:[%s1567_s14] sm:$0xff] }
  0x14   :  { %1167 = vmatprep.subr.bf16.mxu1 %v1288_v1  ;;  %1075 = vmatprep.mubr.msk.f32.mxu1 %vm1287_vm0, %v1286_v0  ;;  %v65_v6 = vld [vmem:[%s1567_s14 + $0x8] sm:$0xff]  ;;  %v66_v7 = vld [vmem:[%s1567_s14 + $0x10] sm:$0xff]  ;;  %v95_v8 = vsel %vm93_vm1, %v1217_v4, 0  ;;  %v67_v10 = vld [vmem:[%s1567_s14 + $0x18] sm:$0xff]  ;;  %vm89_vm2 = vcmask 310272   ;;  %vm139_vm3 = vcmask 261120  }
  0x15   :  { %1058 = vmatpush3.bf16.msra.mxu0 %v1215_v2  ;;  %v1415_v9 = vpack.c.bf16 %v65_v6, %v64_v5  ;;  %v1421_v11 = vpack.c.bf16 %v67_v10, %v66_v7  ;;  %v1425_v12 = vld [vmem:[#allocation2] sm:$0xf]  ;;  %s1289_s28 = smov 42   ;;  %v1219_v20 = vld [vmem:[%s1558_s5 + $0x8] sm:$0xff]   ;;  %s1290_s20 = smov 58   ;;  %vm956_vm7 = vcmask 64512  }
  0x16   :  { %1059 = vmatprep.subr.bf16.mxu0 %v1286_v0  ;;  %v1218_v18 = vld [vmem:[%s1558_s5] sm:$0xff]   ;;  %v918_v19 = vunpack.c.l.bf16 %v1425_v12  ;;  %v1221_v39 = vld [vmem:[%s1557_s4 + $0x8] sm:$0xff]   ;;  %v1222_v40 = vld [vmem:[%s1557_s4 + $0x10] ss:$0 sps:$4 sm:$0x77]   ;;  %s1293_s18 = smov 120  }
  0x17   :  { %1169 = vmatpush3.bf16.msra.mxu1 %v1415_v9  ;;  %v984_v30 = vld [vmem:[%s1555_s2] ss:$0 sm:$0xff]  ;;  %v391_v41 = vsel %vm93_vm1, %v1222_v40, 0  ;;  %v1224_v57 = vld [vmem:[%s1562_s9 + $0x8] sm:$0xff]   ;;  %s1295_s19 = smov 86   ;;  %vm958_vm8 = vcmask 80896  }
  0x18   :  { %1170 = vmatprep.subr.bf16.mxu1 %v1288_v1  ;;  %920 = vrot.lane.b32.xlu1 %v918_v19, %s1289_s28  ;;  %v985_v32 = vld [vmem:[%s1556_s3] ss:$0 sm:$0xff]  ;;  %vm960_vm9 = vcmask 343040  }
  0x19   :  { %1060 = vmatpush3.bf16.msra.mxu0 %v1216_v3  ;;  %v1220_v37 = vld [vmem:[%s1557_s4] sm:$0xff]  }
  0x1a   :  { %1061 = vmatprep.subr.bf16.mxu0 %v1286_v0  ;;  %v993_v47 = vld [vmem:[%s1559_s6] ss:$0 sm:$0xff] }
  0x1b   :  { %1172 = vmatpush3.bf16.msra.mxu1 %v1421_v11  ;;  %v1223_v56 = vld [vmem:[%s1562_s9] sm:$0xff]  }
  0x1c   :  { %1173 = vmatprep.subr.bf16.mxu1 %v1288_v1  ;;  %v996_v5 = vld [vmem:[%s1560_s7] ss:$0 sm:$0xff] }
  0x1d   :  { %1062 = vmatpush3.bf16.msra.mxu0 %v95_v8  ;;  %v997_v7 = vld [vmem:[%s1561_s8] ss:$0 sm:$0xff] }
  0x1e   :  { %1179 = vmatprep.subr.bf16.mxu0 %v1288_v1 }
  0x20   :  { %1064 = vmatmul.mubr.msk.bf16.vlgmr.msra.gmra.mrb[0].mxu0 %vm89_vm2, %v1425_v12 }
  0x21   :  { %1181 = vmatpush3.bf16.msra.mxu0 %v1415_v9  ;;  %1115 = vmatprep.mubr.msk.f32.mxu0 %vm1287_vm0, %v1286_v0 }
  0x22   :  { %1182 = vmatprep.subr.bf16.mxu0 %v1288_v1 }
  0x25   :  { %1184 = vmatpush3.bf16.msra.mxu0 %v1421_v11 }
  0x26   :  { %1185 = vmatprep.subr.bf16.mxu0 %v1288_v1 }
  0xf3   :  { %v131_v13 = vpop.f32.mrb[0].mxu0 }
  0xf4   :  { %v1065_v14 = vpop.f32.mrb[1].mxu0  ;;  %1076 = vmatmul.mubr.msk.f32.vlgmr.msra.gmra.mrb[0].mxu1 %vm139_vm3, %v131_v13  ;;  %v213_v17 = vmul.f32 %v131_v13, %v131_v13 }
  0xf5   :  { %1175 = vmatpush3.bf16.msra.mxu1 %v1415_v9  ;;  %v134_v15 = vpop.f32.mrb[2].mxu0  ;;  %1086 = vmatprep.mubr.msk.f32.mxu1 %vm1287_vm0, %v1286_v0 }
  0xf6   :  { %v1066_v16 = vpop.f32.mrb[3].mxu0  ;;  %1176 = vmatprep.subr.bf16.mxu1 %v1288_v1 }
  0xf9   :  { %1178 = vmatpush3.bf16.msra.mxu1 %v1421_v11 }
  0xfa   :  { %1089 = vmatprep.subr.bf16.mxu1 %v1286_v0 }
  0xfc   :  { %1087 = vmatmul.mubr.msk.f32.vlgmr.msra.gmra.mrb[2].mxu1 %vm139_vm3, %v213_v17 }
  0xfd   :  { %1093 = vmatprep.mubr.msk.bf16.mxu1 %vm1287_vm0, %v1286_v0  ;;  %1090 = vmatpush3.bf16.msra.mxu1 %v1218_v18 }
  0xfe   :  { %1091 = vmatprep.subr.bf16.mxu1 %v1286_v0 }
 0x101   :  { %1092 = vmatpush3.bf16.msra.mxu1 %v1219_v20 }
 0x102   :  { %1097 = vmatprep.subr.bf16.mxu1 %v1286_v0 }
 0x1c7   :  { %v209_v21 = vpop.f32.mrb[0].mxu1 }
 0x1c8   :  { %v289_v22 = vsub.f32 %v131_v13, %v209_v21  ;;  %v1077_v23 = vpop.f32.mrb[1].mxu1  ;;  %v287_v24 = vmul.f32 %v209_v21, %v209_v21 }
 0x1cf   :  { %v283_v25 = vpop.f32.mrb[2].mxu1 }
 0x1d0   :  { %v288_v26 = vsub.f32 %v283_v25, %v287_v24  ;;  %v1088_v27 = vpop.f32.mrb[3].mxu1 }
 0x1d2   :  { %v290_v28 = vadd.f32 1e-05, %v288_v26  ;;  %v1003_v26 = vld [vmem:[%s1563_s10] ss:$0 sm:$0xff]  ;;  %s1291_s10 = smov 50  }
 0x1d4   :  { %1227 = vrsqrt.f32 %v290_v28 }
 0x1de   :  { %v1228_v29 = vpop.eup %1227 }
 0x1df   :  { %v292_v31 = vmul.f32 %v1228_v29, %v289_v22 }
 0x1e1   :  { %v299_v33 = vmul.f32 %v984_v30, %v292_v31 }
 0x1e3   :  { %v306_v34 = vadd.f32 %v985_v32, %v299_v33  ;;  %v1005_v33 = vld [vmem:[%s1566_s13] ss:$0 sm:$0xff]  ;;  %s1294_s13 = smov 96  }
 0x1e5   :  { %vm307_vm4 = vcmp.gt.f32.partialorder %v306_v34, 0.0  ;;  %v308_v35 = vmul.f32 0.1, %v306_v34 }
 0x1e7   :  { %v309_v36 = vsel %vm307_vm4, %v306_v34, %v308_v35 }
 0x1e8   :  { %935 = vrot.lane.b32.xlu1 %v309_v36, %s1290_s20  ;;  %v315_v38 = vpack.c.bf16 %v309_v36, %v309_v36  ;;  %s1296_s20 = smov [#allocation5]  }
 0x1e9   :  { %s969_s2 = sshll.u32 %s1296_s20, 4  ;;  %s970_s2 = int_to_ptr.vmem [resolvable:$true] %s969_s2 }
 0x1ea   :  { %1094 = vmatmul.mubr.msk.bf16.vlgmr.msra.gmra.mrb[4].mxu1 %vm139_vm3, %v315_v38  ;;  %s1259_s21 = scalar_lea.vmem %s970_s2, 128  ;;  %p1264_p9 = scmp.lt.s32.totalorder %s970_s2, %s970_s2 }
 0x1eb   :  { %1098 = vmatpush3.bf16.msra.mxu1 %v1220_v37  ;;  %1103 = vmatprep.mubr.msk.bf16.mxu1 %vm1287_vm0, %v1286_v0  ;;  %p1260_p8 = scmp.ne.s32.totalorder %s970_s2, %s1259_s21  ;;  %p1265_p10 = scmp.lt.s32.totalorder %s1259_s21, %s1259_s21 }
 0x1ec   :  { %1099 = vmatprep.subr.bf16.mxu1 %v1286_v0 }
 0x1ed   :  { %p1266_p11 = por %p1265_p10, %p1264_p9 }
 0x1ef   :  { %1100 = vmatpush3.bf16.msra.mxu1 %v1221_v39  ;;  %p1267_p12 = pnand %p1266_p11, %p1260_p8 }
 0x1f0   :  { %1101 = vmatprep.subr.bf16.mxu1 %v1286_v0 }
 0x1f3   :  { %1102 = vmatpush3.bf16.msra.mxu1 %v391_v41 }
 0x1f4   :  { %1129 = vmatprep.subr.bf16.mxu1 %v1286_v0 }
 0x1f6   :  { %1104 = vmatmul.mubr.msk.bf16.vlgmr.msra.gmra.mrb[8].mxu1 %vm89_vm2, %v1425_v12 }
 0x1f7   :  { %1133 = vmatprep.mubr.msk.bf16.mxu1 %vm1287_vm0, %v1286_v0  ;;  %1130 = vmatpush3.bf16.msra.mxu1 %v1223_v56 }
 0x1f8   :  { %1131 = vmatprep.subr.bf16.mxu1 %v1286_v0 }
 0x1fb   :  { %1132 = vmatpush3.bf16.msra.mxu1 %v1224_v57 }
 0x1fc   :  { %1197 = vmatprep.subr.bf16.mxu1 %v1288_v1 }
 0x2bd   :  { %v369_v42 = vpop.f32.mrb[4].mxu1 }
 0x2be   :  { %v1095_v43 = vpop.f32.mrb[5].mxu1 }
 0x2bf   :  { %v372_v44 = vpop.f32.mrb[6].mxu1 }
 0x2c0   :  { %v1096_v45 = vpop.f32.mrb[7].mxu1 }
 0x2c9   :  { %v427_v46 = vpop.f32.mrb[8].mxu1 }
 0x2ca   :  { %v428_v48 = vadd.f32 %v427_v46, %v369_v42  ;;  %v1105_v49 = vpop.f32.mrb[9].mxu1 }
 0x2cb   :  { %v430_v50 = vpop.f32.mrb[10].mxu1 }
 0x2cc   :  { %v440_v51 = vadd.f32 %v993_v47, %v428_v48  ;;  %v1106_v52 = vpop.f32.mrb[11].mxu1  ;;  %v921_v47 = vpop.permute.xlu1 %920 }
 0x2ce   :  { %vm441_vm5 = vcmp.gt.f32.partialorder %v440_v51, 0.0  ;;  %v442_v53 = vmul.f32 0.1, %v440_v51 }
 0x2d0   :  { %v443_v54 = vsel %vm441_vm5, %v440_v51, %v442_v53  ;;  %v936_v49 = vpop.permute.xlu1 %935 }
 0x2d1   :  { %1116 = vmatmul.mubr.msk.f32.vlgmr.msra.gmra.mrb[4].mxu0 %vm139_vm3, %v443_v54  ;;  %v519_v55 = vmul.f32 %v443_v54, %v443_v54 }
 0x2d2   :  { %1187 = vmatpush3.bf16.msra.mxu0 %v1415_v9  ;;  %1126 = vmatprep.mubr.msk.f32.mxu0 %vm1287_vm0, %v1286_v0 }
 0x2d3   :  { %1188 = vmatprep.subr.bf16.mxu0 %v1288_v1 }
 0x2d6   :  { %1190 = vmatpush3.bf16.msra.mxu0 %v1421_v11 }
 0x2d7   :  { %1191 = vmatprep.subr.bf16.mxu0 %v1288_v1 }
 0x2d9   :  { %1127 = vmatmul.mubr.msk.f32.vlgmr.msra.gmra.mrb[6].mxu0 %vm139_vm3, %v519_v55 }
 0x2da   :  { %1193 = vmatpush3.bf16.msra.mxu0 %v1415_v9  ;;  %1145 = vmatprep.mubr.msk.f32.mxu0 %vm1287_vm0, %v1286_v0 }
 0x2db   :  { %1194 = vmatprep.subr.bf16.mxu0 %v1288_v1 }
 0x2de   :  { %1196 = vmatpush3.bf16.msra.mxu0 %v1421_v11 }
 0x2df   :  { %1159 = vmatprep.subr.bf16.mxu0 %v1286_v0 }
 0x3a4   :  { %v515_v58 = vpop.f32.mrb[4].mxu0 }
 0x3a5   :  { %v1117_v59 = vpop.f32.mrb[5].mxu0  ;;  %v593_v60 = vmul.f32 %v515_v58, %v515_v58  ;;  %v595_v3 = vsub.f32 %v443_v54, %v515_v58 }
 0x3ac   :  { %v589_v61 = vpop.f32.mrb[6].mxu0 }
 0x3ad   :  { %v594_v62 = vsub.f32 %v589_v61, %v593_v60  ;;  %v1128_v63 = vpop.f32.mrb[7].mxu0 }
 0x3af   :  { %v596_v2 = vadd.f32 1e-05, %v594_v62 }
 0x3b1   :  { %1229 = vrsqrt.f32 %v596_v2 }
 0x3bb   :  { %v1230_v4 = vpop.eup %1229 }
 0x3bc   :  { %v598_v6 = vmul.f32 %v1230_v4, %v595_v3 }
 0x3be   :  { %v605_v8 = vmul.f32 %v996_v5, %v598_v6 }
 0x3c0   :  { %v612_v10 = vadd.f32 %v997_v7, %v605_v8 }
 0x3c2   :  { %v613_v12 = vpack.c.bf16 %v612_v10, %v612_v10 }
 0x3c4   :  { %1134 = vmatmul.mubr.msk.bf16.vlgmr.msra.gmra.mrb[12].mxu1 %vm139_vm3, %v613_v12 }
 0x3c5   :  { %1199 = vmatpush3.bf16.msra.mxu1 %v1415_v9  ;;  %1156 = vmatprep.mubr.msk.f32.mxu1 %vm1287_vm0, %v1286_v0  ;;  %v1225_v9 = vld [vmem:[%s1565_s12] sm:$0xff]  }
 0x3c6   :  { %1200 = vmatprep.subr.bf16.mxu1 %v1288_v1  ;;  %v1226_v1 = vld [vmem:[%s1565_s12 + $0x8] sm:$0xff]  }
 0x3c9   :  { %1202 = vmatpush3.bf16.msra.mxu1 %v1421_v11 }
 0x497   :  { %v667_v13 = vpop.f32.mrb[12].mxu1 }
 0x498   :  { %v748_v14 = vmul.f32 %v667_v13, %v667_v13  ;;  %v1135_v15 = vpop.f32.mrb[13].mxu1  ;;  %1146 = vmatmul.mubr.msk.f32.vlgmr.msra.gmra.mrb[8].mxu0 %vm139_vm3, %v667_v13 }
 0x499   :  { %v670_v16 = vpop.f32.mrb[14].mxu1  ;;  %1163 = vmatprep.mubr.msk.bf16.mxu0 %vm1287_vm0, %v1286_v0  ;;  %1160 = vmatpush3.bf16.msra.mxu0 %v1225_v9 }
 0x49a   :  { %v1136_v17 = vpop.f32.mrb[15].mxu1  ;;  %1157 = vmatmul.mubr.msk.f32.vlgmr.msra.gmra.mrb[16].mxu1 %vm139_vm3, %v748_v14  ;;  %1161 = vmatprep.subr.bf16.mxu0 %v1286_v0  ;;  %v1004_v0 = vld [vmem:[%s1564_s11] ss:$0 sm:$0xff]  ;;  %s1292_s11 = smov 80  }
 0x49d   :  { %1162 = vmatpush3.bf16.msra.mxu0 %v1226_v1 }
 0x56b   :  { %v744_v11 = vpop.f32.mrb[8].mxu0 }
 0x56c   :  { %v822_v18 = vmul.f32 %v744_v11, %v744_v11  ;;  %v824_v19 = vsub.f32 %v667_v13, %v744_v11  ;;  %v1147_v20 = vpop.f32.mrb[9].mxu0 }
 0x56d   :  { %v818_v21 = vpop.f32.mrb[16].mxu1 }
 0x56e   :  { %v823_v22 = vsub.f32 %v818_v21, %v822_v18  ;;  %v1158_v23 = vpop.f32.mrb[17].mxu1 }
 0x570   :  { %v825_v24 = vadd.f32 1e-05, %v823_v22 }
 0x572   :  { %1231 = vrsqrt.f32 %v825_v24 }
 0x57c   :  { %v1232_v25 = vpop.eup %1231 }
 0x57d   :  { %v827_v27 = vmul.f32 %v1232_v25, %v824_v19 }
 0x57f   :  { %v834_v28 = vmul.f32 %v1003_v26, %v827_v27 }
 0x581   :  { %v841_v29 = vadd.f32 %v1004_v0, %v834_v28 }
 0x583   :  { %vm842_vm6 = vcmp.gt.f32.partialorder %v841_v29, 0.0  ;;  %v843_v30 = vmul.f32 0.1, %v841_v29 }
 0x585   :  { %v844_v31 = vsel %vm842_vm6, %v841_v29, %v843_v30 }
 0x586   :  { %v845_v32 = vpack.c.bf16 %v844_v31, %v844_v31 }
 0x588   :  { %1164 = vmatmul.mubr.msk.bf16.vlgmr.msra.gmra.mrb[12].mxu0 %vm139_vm3, %v845_v32 }
 0x65b   :  { %v906_v34 = vpop.f32.mrb[12].mxu0 }
 0x65c   :  { %v907_v35 = vadd.f32 %v1005_v33, %v906_v34  ;;  %v1165_v36 = vpop.f32.mrb[13].mxu0 }
 0x65d   :  { %v909_v37 = vpop.f32.mrb[14].mxu0 }
 0x65e   :  { %925 = vrot.lane.b32.xlu0 %v907_v35, %s1291_s10  ;;  %v1166_v38 = vpop.f32.mrb[15].mxu0  ;;  %v1009_v39 = vmul.f32 -1.442695, %v907_v35 }
 0x660   :  { %1233 = vpow2.f32 %v1009_v39 }
 0x662   :  { %939 = vrot.lane.b32.xlu0 %v907_v35, %s1292_s11 }
 0x66a   :  { %v1234_v40 = vpop.eup %1233 }
 0x66b   :  { %v915_v41 = vadd.f32 1.0, %v1234_v40 }
 0x66d   :  { %1235 = vrcp.f32 %v915_v41 }
 0x677   :  { %v1236_v42 = vpop.eup %1235 }
 0x678   :  { %v923_v48 = vmul.f32 %v1236_v42, %v921_v47  ;;  %v938_v52 = vmul.f32 %v1236_v42, %v936_v49 }
 0x6d0   :  { %v926_v43 = vpop.permute.xlu0 %925 }
 0x6d1   :  { %v928_v44 = vmul.f32 %v1236_v42, %v926_v43 }
 0x6d3   :  { %930 = vrot.lane.b32.xlu0 %v928_v44, %s1293_s18 }
 0x6d4   :  { %v940_v45 = vpop.permute.xlu0 %939 }
 0x6d5   :  { %v942_v46 = vmul.f32 %v1236_v42, %v940_v45 }
 0x6d7   :  { %944 = vrot.lane.b32.xlu1 %v942_v46, %s1294_s13 }
 0x745   :  { %v931_v50 = vpop.permute.xlu0 %930 }
 0x746   :  { %v933_v51 = vadd.f32 %v931_v50, %v923_v48 }
 0x748   :  { %949 = vrot.lane.b32.xlu0 %v933_v51, %s1295_s19 }
 0x749   :  { %v945_v53 = vpop.permute.xlu1 %944 }
 0x74a   :  { %v947_v54 = vadd.f32 %v945_v53, %v938_v52 }
 0x74c   :  { %953 = vrot.lane.b32.xlu1 %v947_v54, %s1292_s11 }
 0x7ba   :  { %v950_v55 = vpop.permute.xlu0 %949 }
 0x7bb   :  { %v957_v56 = vsel %vm956_vm7, %v950_v55, %v907_v35 }
 0x7be   :  { %v954_v57 = vpop.permute.xlu1 %953 }
 0x7bf   :  { %v959_v58 = vsel %vm958_vm8, %v957_v56, %v954_v57 }
 0x7c0   :  { %v961_v59 = vsel %vm960_vm9, %v959_v58, 0.0 }
 0x7c1   :  { %962 = vst [vmem:[#allocation5] sm:$0xff] %v961_v59 }
 0x7c2   :  { %1270 = shalt.err (!%p1267_p12)
}
 0x7c3   :  { %s1271_s4 = scalar_lea.hbm %s1568_s15, 128 }
 0x7c4   :  { %p1272_p13 = scmp.ne.s32.totalorder %s1568_s15, %s1271_s4  ;;  %p1275_p0 = scmp.lt.u32.totalorder %s1271_s4, %s1568_s15 }
 0x7c6   :  { %p1277_p1 = pnand %p1275_p0, %p1272_p13 }
 0x7c8   :  { %1280 = shalt.err (!%p1277_p1)
}
 0x7c9   :  { %972 = dma.vmem_to_hbm [thread:$0]  %s970_s2, 128, %s1568_s15, [#allocation4]  }
 0x7ca   :  { %1283 = dma.done.wait [#allocation4], 128  }
 0x7cb   :  { %1284 = vsyncadd [#allocation4], 4294967168 }
 0x7cc   :  { %976 = vsyncpa [#allocation3], 1 }
 0x7cd   :  { %977 = vsyncpa [#allocation4], 1 }

</bundles_post_ra>
